<compile_context>
chip_gen: v6e
topology: v6e:2x2x1
jax: 0.10.0
libtpu: 0.0.40
codegen_flags: <defaults>
</compile_context>

<pallas_src>
import functools
import math

import jax
import jax.numpy as jnp
from jax import lax
from jax.experimental import pallas as pl
from jax.experimental.pallas import tpu as pltpu

_NEG_INF = -1e9   # additive causal-mask value (NaN-safe stand-in for -inf)
_LN_EPS = 1e-5    # PyTorch nn.LayerNorm default eps


# ---------------------------------------------------------------------------
# tiling helpers
# ---------------------------------------------------------------------------
def _round_up(x: int, m: int) -> int:
    return ((x + m - 1) // m) * m


def _mxu_pref() -> int:
    """Preferred M/N matmul tile: 256 on v6e/v7x (2x256^2 MXU), 128 otherwise (v5e 4x128^2)."""
    try:
        kind = jax.devices()[0].device_kind.lower()
    except Exception:
        return 128
    return 256 if ("v6" in kind or "v7" in kind) else 128


def _row_plan(m: int, pref: int):
    """(tile, padded_m): padded_m % tile == 0, tile a multiple of 8 and bounded by pref."""
    if m < pref:
        p = _round_up(m, 8)
        return p, p
    return pref, _round_up(m, pref)


def _lane_plan(n: int, pref: int):
    """(tile, padded_n): padded_n % tile == 0, tile a multiple of 128 (lane-dense stores)."""
    n_pad = _round_up(n, 128)
    if n_pad < pref:
        return n_pad, n_pad
    if n_pad % pref == 0:
        return pref, n_pad
    return 128, n_pad


def _k_plan(k: int) -> int:
    for tk in (512, 256, 128):
        if k % tk == 0:
            return tk
    return k   # small / odd contraction dim: single full-width block


def _seq_tile(s: int, cap: int = 256) -> int:
    if s <= cap:
        return s
    t = cap - cap % 8
    while t >= 8:
        if s % t == 0:
            return t
        t -= 8
    return s


def build_pe_table(d_model: int, max_len: int) -> jnp.ndarray:
    """Sinusoidal PE table, identical to PositionalEncoding.__init__ (even d_model)."""
    if d_model % 2 != 0:
        raise ValueError("d_model must be even for sin/cos interleaving")
    position = jnp.arange(0, max_len, dtype=jnp.float32)[:, None]
    div_term = jnp.exp(
        jnp.arange(0, d_model, 2, dtype=jnp.float32) * (-math.log(10000.0) / d_model)
    )
    angles = position * div_term
    pe = jnp.zeros((max_len, d_model), dtype=jnp.float32)
    pe = pe.at[:, 0::2].set(jnp.sin(angles))
    pe = pe.at[:, 1::2].set(jnp.cos(angles))
    return pe


def causal_mask(sz: int) -> jnp.ndarray:
    """generate_square_subsequent_mask: additive mask, -inf above the diagonal."""
    return jnp.where(
        jnp.triu(jnp.ones((sz, sz), dtype=bool), k=1), _NEG_INF, 0.0
    ).astype(jnp.float32)


# ---------------------------------------------------------------------------
# kernel 1: fused embedding scale + positional-encoding add
#           (PE indexed by seq tile only -> no (B,S,D) broadcast materialized)
# ---------------------------------------------------------------------------
def _scale_pe_kernel(x_ref, pe_ref, o_ref, *, scale):
    o_ref[...] = x_ref[...] * scale + pe_ref[...]


def scaled_embedding_plus_pe(emb, pe, scale):
    """emb: (B, S, D); pe: (S, D).  Returns emb * scale + pe (pe broadcast over batch)."""
    B, S, D = emb.shape
    ts = _seq_tile(S)
    return pl.pallas_call(
        functools.partial(_scale_pe_kernel, scale=scale),
        out_shape=jax.ShapeDtypeStruct((B, S, D), emb.dtype),
        grid_spec=pltpu.PrefetchScalarGridSpec(
            num_scalar_prefetch=0,
            grid=(B, S // ts),
            in_specs=[
                pl.BlockSpec((pl.Squeezed(), ts, D), lambda b, s: (b, s, 0)),
                pl.BlockSpec((ts, D), lambda b, s: (s, 0)),   # independent of b
            ],
            out_specs=pl.BlockSpec((pl.Squeezed(), ts, D), lambda b, s: (b, s, 0)),
        ),
        compiler_params=pltpu.CompilerParams(
            dimension_semantics=("parallel", "parallel")
        ),
    )(emb, pe.astype(emb.dtype))


# ---------------------------------------------------------------------------
# kernel 2: tiled bf16 matmul + f32 bias (+ optional fused ReLU)
# ---------------------------------------------------------------------------
def _linear_kernel(x_ref, w_ref, b_ref, o_ref, acc_ref, *, relu):
    @pl.when(pl.program_id(2) == 0)
    def _():
        acc_ref[...] = jnp.zeros_like(acc_ref)

    acc_ref[...] += jnp.dot(x_ref[...], w_ref[...], preferred_element_type=jnp.float32)

    @pl.when(pl.program_id(2) == pl.num_programs(2) - 1)
    def _():
        y = acc_ref[...] + b_ref[...]
        if relu:
            y = jnp.maximum(y, 0.0)
        o_ref[...] = y.astype(o_ref.dtype)


def linear(x, w, b, relu=False, out_dtype=jnp.float32):
    """x: (..., K) @ w: (K, N) + b: (N,); bf16 MXU inputs, f32 accumulate, fused ReLU.

    M is padded to a multiple of 8/tile and N to a multiple of 128 so every output block
    is lane-dense (no masked stores); padding is sliced off in the wrapper.
    """
    *lead, K = x.shape
    N = w.shape[1]
    M = int(math.prod(lead)) if lead else 1
    pref = _mxu_pref()
    tm, Mp = _row_plan(M, pref)
    tn, Np = _lane_plan(N, pref)
    tk = _k_plan(K)

    x2 = x.reshape(M, K).astype(jnp.bfloat16)
    w2 = w.astype(jnp.bfloat16)
    b2 = b.astype(jnp.float32)
    if Mp != M:
        x2 = jnp.pad(x2, ((0, Mp - M), (0, 0)))
    if Np != N:
        w2 = jnp.pad(w2, ((0, 0), (0, Np - N)))
        b2 = jnp.pad(b2, (0, Np - N))

    out = pl.pallas_call(
        functools.partial(_linear_kernel, relu=relu),
        out_shape=jax.ShapeDtypeStruct((Mp, Np), out_dtype),
        grid_spec=pltpu.PrefetchScalarGridSpec(
            num_scalar_prefetch=0,
            grid=(Mp // tm, Np // tn, K // tk),
            in_specs=[
                pl.BlockSpec((tm, tk), lambda i, j, k: (i, k)),
                pl.BlockSpec((tk, tn), lambda i, j, k: (k, j)),
                pl.BlockSpec((1, tn), lambda i, j, k: (0, j)),
            ],
            out_specs=pl.BlockSpec((tm, tn), lambda i, j, k: (i, j)),
            scratch_shapes=[pltpu.VMEM((tm, tn), jnp.float32)],
        ),
        compiler_params=pltpu.CompilerParams(
            dimension_semantics=("parallel", "parallel", "arbitrary")
        ),
    )(x2, w2, b2.reshape(1, Np))
    if Mp != M:
        out = out[:M]
    if Np != N:
        out = out[:, :N]
    return out.reshape(*lead, N)


# ---------------------------------------------------------------------------
# kernel 3: bf16 matmul with fused bias + residual-add + LayerNorm epilogue
# ---------------------------------------------------------------------------
def _linear_add_ln_kernel(x_ref, w_ref, b_ref, r_ref, g_ref, bb_ref, o_ref, acc_ref, *, eps):
    @pl.when(pl.program_id(1) == 0)
    def _():
        acc_ref[...] = jnp.zeros_like(acc_ref)

    acc_ref[...] += jnp.dot(x_ref[...], w_ref[...], preferred_element_type=jnp.float32)

    @pl.when(pl.program_id(1) == pl.num_programs(1) - 1)
    def _():
        y = acc_ref[...] + b_ref[...] + r_ref[...].astype(jnp.float32)
        mu = jnp.mean(y, axis=-1, keepdims=True)
        yc = y - mu
        var = jnp.mean(yc * yc, axis=-1, keepdims=True)
        inv = lax.rsqrt(var + eps)
        o_ref[...] = (yc * inv * g_ref[...] + bb_ref[...]).astype(o_ref.dtype)


def linear_add_layernorm(x, w, b, res, gamma, beta):
    """LayerNorm(res + x @ w + b): bias + residual + LN fused into the matmul epilogue."""
    *lead, K = x.shape
    D = w.shape[1]
    assert D % 128 == 0, "LN-fused linear needs a lane-dense model dim in one block"
    M = int(math.prod(lead)) if lead else 1
    tm, Mp = _row_plan(M, _mxu_pref())
    tk = _k_plan(K)

    x2 = x.reshape(M, K).astype(jnp.bfloat16)
    r2 = res.reshape(M, D).astype(jnp.float32)
    if Mp != M:
        x2 = jnp.pad(x2, ((0, Mp - M), (0, 0)))
        r2 = jnp.pad(r2, ((0, Mp - M), (0, 0)))

    out = pl.pallas_call(
        functools.partial(_linear_add_ln_kernel, eps=_LN_EPS),
        out_shape=jax.ShapeDtypeStruct((Mp, D), jnp.float32),
        grid_spec=pltpu.PrefetchScalarGridSpec(
            num_scalar_prefetch=0,
            grid=(Mp // tm, K // tk),
            in_specs=[
                pl.BlockSpec((tm, tk), lambda i, k: (i, k)),
                pl.BlockSpec((tk, D), lambda i, k: (k, 0)),
                pl.BlockSpec((1, D), lambda i, k: (0, 0)),
                pl.BlockSpec((tm, D), lambda i, k: (i, 0)),
                pl.BlockSpec((1, D), lambda i, k: (0, 0)),
                pl.BlockSpec((1, D), lambda i, k: (0, 0)),
            ],
            out_specs=pl.BlockSpec((tm, D), lambda i, k: (i, 0)),
            scratch_shapes=[pltpu.VMEM((tm, D), jnp.float32)],
        ),
        compiler_params=pltpu.CompilerParams(
            dimension_semantics=("parallel", "arbitrary")
        ),
    )(x2, w.astype(jnp.bfloat16), b.astype(jnp.float32).reshape(1, D), r2,
      gamma.astype(jnp.float32).reshape(1, D), beta.astype(jnp.float32).reshape(1, D))
    if Mp != M:
        out = out[:M]
    return out.reshape(*lead, D)


# ---------------------------------------------------------------------------
# kernel 4: multi-head attention, lane-dense (B, S, D) blocks, heads sliced in-kernel
# ---------------------------------------------------------------------------
def _attention_core(q, k, v, mask, nhead, scale):
    """q: (Sq, D), k/v: (Sk, D) bf16 arrays; per-head SDPA on lane slices -> (Sq, D) f32."""
    _, D = q.shape
    hd = D // nhead
    outs = []
    for h in range(nhead):            # nhead is a compile-time constant (static unroll)
        lo = h * hd
        qh = q[:, lo:lo + hd]
        kh = k[:, lo:lo + hd]
        vh = v[:, lo:lo + hd]
        s = jnp.dot(qh, kh.T, preferred_element_type=jnp.float32) * scale
        if mask is not None:
            s = s + mask
        s = s - jnp.max(s, axis=-1, keepdims=True)
        p = jnp.exp(s)
        inv = pl.reciprocal(jnp.sum(p, axis=-1, keepdims=True), approx=True)
        outs.append(jnp.dot((p * inv).astype(jnp.bfloat16), vh,
                            preferred_element_type=jnp.float32))
    return jnp.concatenate(outs, axis=-1)


def _self_attn_kernel(*refs, nhead, scale, has_mask):
    if has_mask:
        qkv_ref, m_ref, o_ref = refs
        mask = m_ref[...]
    else:
        qkv_ref, o_ref = refs
        mask = None
    D = o_ref.shape[-1]
    qkv = qkv_ref[...].astype(jnp.bfloat16)
    q, k, v = qkv[:, :D], qkv[:, D:2 * D], qkv[:, 2 * D:]
    o_ref[...] = _attention_core(q, k, v, mask, nhead, scale).astype(o_ref.dtype)


def _cross_attn_kernel(q_ref, kv_ref, o_ref, *, nhead, scale):
    D = o_ref.shape[-1]
    q = q_ref[...].astype(jnp.bfloat16)
    kv = kv_ref[...].astype(jnp.bfloat16)
    o_ref[...] = _attention_core(q, kv[:, :D], kv[:, D:], None, nhead, scale).astype(o_ref.dtype)


def self_attention(qkv, mask, nhead, scale):
    """qkv: (B, S, 3D) fused Q|K|V projections; mask: (S, S) additive or None -> (B, S, D)."""
    # TODO(synk): for long sequences, switch to flash-style KV tiling (grid over q/kv tiles
    # with online-softmax scratch) so the (S,S) scores never materialize in VMEM (v7x first).
    B, S, threeD = qkv.shape
    D = threeD // 3
    has_mask = mask is not None
    in_specs = [pl.BlockSpec((pl.Squeezed(), S, threeD), lambda b: (b, 0, 0))]
    args = [qkv]
    if has_mask:
        in_specs.append(pl.BlockSpec((S, S), lambda b: (0, 0)))
        args.append(mask)
    return pl.pallas_call(
        functools.partial(_self_attn_kernel, nhead=nhead, scale=scale, has_mask=has_mask),
        out_shape=jax.ShapeDtypeStruct((B, S, D), jnp.bfloat16),
        grid_spec=pltpu.PrefetchScalarGridSpec(
            num_scalar_prefetch=0,
            grid=(B,),
            in_specs=in_specs,
            out_specs=pl.BlockSpec((pl.Squeezed(), S, D), lambda b: (b, 0, 0)),
        ),
        compiler_params=pltpu.CompilerParams(dimension_semantics=("parallel",)),
    )(*args)


def cross_attention(q, kv, nhead, scale):
    """q: (B, Sq, D); kv: (B, Sk, 2D) fused K|V projections; no mask -> (B, Sq, D)."""
    B, Sq, D = q.shape
    Sk = kv.shape[1]
    return pl.pallas_call(
        functools.partial(_cross_attn_kernel, nhead=nhead, scale=scale),
        out_shape=jax.ShapeDtypeStruct((B, Sq, D), jnp.bfloat16),
        grid_spec=pltpu.PrefetchScalarGridSpec(
            num_scalar_prefetch=0,
            grid=(B,),
            in_specs=[
                pl.BlockSpec((pl.Squeezed(), Sq, D), lambda b: (b, 0, 0)),
                pl.BlockSpec((pl.Squeezed(), Sk, 2 * D), lambda b: (b, 0, 0)),
            ],
            out_specs=pl.BlockSpec((pl.Squeezed(), Sq, D), lambda b: (b, 0, 0)),
        ),
        compiler_params=pltpu.CompilerParams(dimension_semantics=("parallel",)),
    )(q, kv)


# ---------------------------------------------------------------------------
# model composition (nn.TransformerEncoder/DecoderLayer, norm_first=False, ReLU FFN)
# ---------------------------------------------------------------------------
def _encoder_layer(p, x, nhead):
    D = x.shape[-1]
    hd = D // nhead
    sa = p["self_attn"]
    qkv = linear(x, sa["w_qkv"], sa["b_qkv"], out_dtype=jnp.bfloat16)
    a = self_attention(qkv, None, nhead, 1.0 / math.sqrt(hd))       # src_mask=None -> no mask
    x = linear_add_layernorm(a, sa["wo"], sa["bo"], x, p["ln1_g"], p["ln1_b"])
    h = linear(x, p["w1"], p["b1"], relu=True, out_dtype=jnp.bfloat16)
    return linear_add_layernorm(h, p["w2"], p["b2"], x, p["ln2_g"], p["ln2_b"])


def _decoder_layer(p, x, memory, tgt_mask, nhead):
    D = x.shape[-1]
    hd = D // nhead
    sa = p["self_attn"]
    qkv = linear(x, sa["w_qkv"], sa["b_qkv"], out_dtype=jnp.bfloat16)
    a = self_attention(qkv, tgt_mask, nhead, 1.0 / math.sqrt(hd))
    x = linear_add_layernorm(a, sa["wo"], sa["bo"], x, p["ln1_g"], p["ln1_b"])

    ca = p["cross_attn"]
    q = linear(x, ca["w_q"], ca["b_q"], out_dtype=jnp.bfloat16)
    kv = linear(memory, ca["w_kv"], ca["b_kv"], out_dtype=jnp.bfloat16)
    c = cross_attention(q, kv, nhead, 1.0 / math.sqrt(hd))           # memory_mask=None
    x = linear_add_layernorm(c, ca["wo"], ca["bo"], x, p["ln2_g"], p["ln2_b"])

    h = linear(x, p["w1"], p["b1"], relu=True, out_dtype=jnp.bfloat16)
    return linear_add_layernorm(h, p["w2"], p["b2"], x, p["ln3_g"], p["ln3_b"])


def transformer_forward(params, src, tgt):
    """src: (B, Ss) int32, tgt: (B, St) int32 -> logits (B, St, tgt_vocab)."""
    D = params["fc_w"].shape[0]
    nhead = params["nhead"]
    _, Ss = src.shape
    St = tgt.shape[1]
    scale = math.sqrt(D)

    # TODO(synk): embedding lookup is a dynamic row gather, done with jnp.take (XLA); the
    # sqrt(d_model) scale and the positional-encoding add ARE fused into one Pallas kernel.
    src_emb = jnp.take(params["src_emb"], src, axis=0)
    tgt_emb = jnp.take(params["tgt_emb"], tgt, axis=0)
    src_x = scaled_embedding_plus_pe(src_emb, params["pe"][:Ss], scale)
    tgt_x = scaled_embedding_plus_pe(tgt_emb, params["pe"][:St], scale)

    # TODO(synk): dropout is eval-mode identity; attn_weights side attributes
    # (last_e_attn / last_d_attn / last_d_cross_attn) are not materialized since they do
    # not affect the returned logits.
    memory = src_x
    for layer in params["encoder"]:
        memory = _encoder_layer(layer, memory, nhead)

    tgt_mask = causal_mask(St)                  # generate_square_subsequent_mask
    x = tgt_x
    for layer in params["decoder"]:
        x = _decoder_layer(layer, x, memory, tgt_mask, nhead)

    # Final vocab projection: N padded to a lane-dense multiple of 128 inside `linear`
    # (TGT_VOCAB=32 would otherwise hit masked partial stores), sliced back in the wrapper.
    return linear(x, params["fc_w"], params["fc_b"], out_dtype=jnp.float32)


# ---------------------------------------------------------------------------
# deterministic parameter init (xavier-uniform like _reset_parameters; zero biases)
# ---------------------------------------------------------------------------
def _xavier(key, shape):
    fan_in, fan_out = shape
    limit = math.sqrt(6.0 / (fan_in + fan_out))
    return jax.random.uniform(key, shape, jnp.float32, -limit, limit)


def _init_self_attn(key, D):
    k1, k2 = jax.random.split(key)
    return dict(w_qkv=_xavier(k1, (D, 3 * D)), b_qkv=jnp.zeros((3 * D,), jnp.float32),
                wo=_xavier(k2, (D, D)), bo=jnp.zeros((D,), jnp.float32))


def _init_cross_attn(key, D):
    k1, k2, k3 = jax.random.split(key, 3)
    return dict(w_q=_xavier(k1, (D, D)), b_q=jnp.zeros((D,), jnp.float32),
                w_kv=_xavier(k2, (D, 2 * D)), b_kv=jnp.zeros((2 * D,), jnp.float32),
                wo=_xavier(k3, (D, D)), bo=jnp.zeros((D,), jnp.float32))


def _init_enc_layer(key, D, F):
    k1, k2, k3 = jax.random.split(key, 3)
    return dict(
        self_attn=_init_self_attn(k1, D),
        w1=_xavier(k2, (D, F)), b1=jnp.zeros((F,), jnp.float32),
        w2=_xavier(k3, (F, D)), b2=jnp.zeros((D,), jnp.float32),
        ln1_g=jnp.ones((D,), jnp.float32), ln1_b=jnp.zeros((D,), jnp.float32),
        ln2_g=jnp.ones((D,), jnp.float32), ln2_b=jnp.zeros((D,), jnp.float32),
    )


def _init_dec_layer(key, D, F):
    k1, k2, k3, k4 = jax.random.split(key, 4)
    return dict(
        self_attn=_init_self_attn(k1, D),
        cross_attn=_init_cross_attn(k2, D),
        w1=_xavier(k3, (D, F)), b1=jnp.zeros((F,), jnp.float32),
        w2=_xavier(k4, (F, D)), b2=jnp.zeros((D,), jnp.float32),
        ln1_g=jnp.ones((D,), jnp.float32), ln1_b=jnp.zeros((D,), jnp.float32),
        ln2_g=jnp.ones((D,), jnp.float32), ln2_b=jnp.zeros((D,), jnp.float32),
        ln3_g=jnp.ones((D,), jnp.float32), ln3_b=jnp.zeros((D,), jnp.float32),
    )


def init_params(key, src_vocab, tgt_vocab, d_model, nhead, n_enc, n_dec, d_ff, max_len):
    keys = jax.random.split(key, 3 + n_enc + n_dec)
    return dict(
        nhead=nhead,
        src_emb=_xavier(keys[0], (src_vocab, d_model)),
        tgt_emb=_xavier(keys[1], (tgt_vocab, d_model)),
        pe=build_pe_table(d_model, max_len),
        encoder=[_init_enc_layer(keys[3 + i], d_model, d_ff) for i in range(n_enc)],
        decoder=[_init_dec_layer(keys[3 + n_enc + i], d_model, d_ff) for i in range(n_dec)],
        fc_w=_xavier(keys[2], (d_model, tgt_vocab)),
        fc_b=jnp.zeros((tgt_vocab,), jnp.float32),
    )


# ---------------------------------------------------------------------------
# plain-JAX reference (non-Pallas) for correctness checking.
# Matmuls mirror the kernels' intentional bf16-input / f32-accumulate MXU numerics
# (the only deliberate deviation from the f32 PyTorch module).
# ---------------------------------------------------------------------------
def reference_forward(params, src, tgt):
    D = params["fc_w"].shape[0]
    H = params["nhead"]
    hd = D // H

    def mm(x, w):
        return jnp.dot(x.astype(jnp.bfloat16), w.astype(jnp.bfloat16),
                       preferred_element_type=jnp.float32)

    def lin(x, w, b):
        return mm(x, w) + b

    def ln(y, g, bb):
        mu = jnp.mean(y, axis=-1, keepdims=True)
        var = jnp.mean((y - mu) ** 2, axis=-1, keepdims=True)
        return (y - mu) * lax.rsqrt(var + _LN_EPS) * g + bb

    def attn(q, k, v, mask):
        B, Sq, _ = q.shape
        Sk = k.shape[1]
        qh = q.reshape(B, Sq, H, hd).transpose(0, 2, 1, 3).astype(jnp.bfloat16)
        kh = k.reshape(B, Sk, H, hd).transpose(0, 2, 1, 3).astype(jnp.bfloat16)
        vh = v.reshape(B, Sk, H, hd).transpose(0, 2, 1, 3).astype(jnp.bfloat16)
        s = jnp.einsum("bhqd,bhkd->bhqk", qh, kh,
                       preferred_element_type=jnp.float32) / math.sqrt(hd)
        if mask is not None:
            s = s + mask[None, None]
        w = jax.nn.softmax(s, axis=-1)
        o = jnp.einsum("bhqk,bhkd->bhqd", w.astype(jnp.bfloat16), vh,
                       preferred_element_type=jnp.float32)
        return o.transpose(0, 2, 1, 3).reshape(B, Sq, D)

    def self_block(p, x, mask):
        qkv = lin(x, p["w_qkv"], p["b_qkv"])
        q, k, v = qkv[..., :D], qkv[..., D:2 * D], qkv[..., 2 * D:]
        return lin(attn(q, k, v, mask), p["wo"], p["bo"])

    def cross_block(p, x, mem):
        q = lin(x, p["w_q"], p["b_q"])
        kv = lin(mem, p["w_kv"], p["b_kv"])
        return lin(attn(q, kv[..., :D], kv[..., D:], None), p["wo"], p["bo"])

    def enc_layer(p, x):
        x = ln(x + self_block(p["self_attn"], x, None), p["ln1_g"], p["ln1_b"])
        f = lin(jax.nn.relu(lin(x, p["w1"], p["b1"])), p["w2"], p["b2"])
        return ln(x + f, p["ln2_g"], p["ln2_b"])

    def dec_layer(p, x, mem, smask):
        x = ln(x + self_block(p["self_attn"], x, smask), p["ln1_g"], p["ln1_b"])
        x = ln(x + cross_block(p["cross_attn"], x, mem), p["ln2_g"], p["ln2_b"])
        f = lin(jax.nn.relu(lin(x, p["w1"], p["b1"])), p["w2"], p["b2"])
        return ln(x + f, p["ln3_g"], p["ln3_b"])

    _, Ss = src.shape
    St = tgt.shape[1]
    src_x = jnp.take(params["src_emb"], src, axis=0) * math.sqrt(D) + params["pe"][None, :Ss]
    tgt_x = jnp.take(params["tgt_emb"], tgt, axis=0) * math.sqrt(D) + params["pe"][None, :St]

    mem = src_x
    for layer in params["encoder"]:
        mem = enc_layer(layer, mem)

    tmask = causal_mask(St)
    x = tgt_x
    for layer in params["decoder"]:
        x = dec_layer(layer, x, mem, tmask)

    return lin(x, params["fc_w"], params["fc_b"])


if __name__ == "__main__":
    SRC_VOCAB, TGT_VOCAB = 32, 32
    D_MODEL, NHEAD = 128, 8          # module defaults: d_model=128, nhead=8
    N_ENC, N_DEC = 2, 2
    D_FF = 256
    MAX_LEN = 16
    B, S_SRC, S_TGT = 2, 8, 8

    root = jax.random.PRNGKey(0)
    k_params, k_src, k_tgt = jax.random.split(root, 3)
    params = init_params(k_params, SRC_VOCAB, TGT_VOCAB, D_MODEL, NHEAD,
                         N_ENC, N_DEC, D_FF, MAX_LEN)
    src = jax.random.randint(k_src, (B, S_SRC), 0, SRC_VOCAB, dtype=jnp.int32)
    tgt = jax.random.randint(k_tgt, (B, S_TGT), 0, TGT_VOCAB, dtype=jnp.int32)

    out = jax.block_until_ready(transformer_forward(params, src, tgt))
    ref = jax.block_until_ready(reference_forward(params, src, tgt))

    assert out.shape == (B, S_TGT, TGT_VOCAB)
    assert bool(jnp.isfinite(out).all()), "non-finite logits"
    assert bool(jnp.allclose(out, ref, rtol=2e-2, atol=2e-2)), "mismatch vs plain-JAX reference"
    print("KERNEL_OK")
</pallas_src>

<mosaic_0001>
module attributes {stable_mosaic.version = 11 : i64} {
  func.func @_scale_pe_kernel(%arg0: i32, %arg1: i32, %arg2: memref<1x8x128xf32, #tpu.memory_space<vmem>>, %arg3: memref<8x128xf32, #tpu.memory_space<vmem>>, %arg4: memref<1x8x128xf32, #tpu.memory_space<vmem>>) attributes {dimension_semantics = [#tpu.dimension_semantics<parallel>, #tpu.dimension_semantics<parallel>], iteration_bounds = array<i64: 2, 1>, scalar_prefetch = 0 : i64, scratch_operands = 0 : i64, tpu.core_type = #tpu.core_type<tc>, window_params = [{transform_indices = @transform_0, window_bounds = array<i64: 1, 8, 128>}, {transform_indices = @transform_1, window_bounds = array<i64: 8, 128>}, {transform_indices = @transform_2, window_bounds = array<i64: 1, 8, 128>}]} {
    %c0 = arith.constant 0 : index
    %c0_0 = arith.constant 0 : index
    %c0_1 = arith.constant 0 : index
    %0 = vector.load %arg2[%c0, %c0_0, %c0_1] : memref<1x8x128xf32, #tpu.memory_space<vmem>>, vector<1x8x128xf32>
    %1 = vector.shape_cast %0 : vector<1x8x128xf32> to vector<8x128xf32>
    %cst = arith.constant 11.3137083 : f32
    %2 = vector.broadcast %cst : f32 to vector<8x128xf32>
    %3 = arith.mulf %1, %2 : vector<8x128xf32>
    %c0_2 = arith.constant 0 : index
    %c0_3 = arith.constant 0 : index
    %4 = vector.load %arg3[%c0_2, %c0_3] : memref<8x128xf32, #tpu.memory_space<vmem>>, vector<8x128xf32>
    %5 = arith.addf %3, %4 : vector<8x128xf32>
    %c0_4 = arith.constant 0 : index
    %c0_5 = arith.constant 0 : index
    %c0_6 = arith.constant 0 : index
    %6 = vector.load %arg4[%c0_4, %c0_5, %c0_6] : memref<1x8x128xf32, #tpu.memory_space<vmem>>, vector<1x8x128xf32>
    %7 = vector.shape_cast %6 : vector<1x8x128xf32> to vector<8x128xf32>
    %8 = vector.shape_cast %5 : vector<8x128xf32> to vector<1x8x128xf32>
    tpu.vector_store %arg4[%c0_4, %c0_5, %c0_6], %8 {strides = array<i32>} : memref<1x8x128xf32, #tpu.memory_space<vmem>>, vector<1x8x128xf32>,
    return
  }
  func.func @transform_0(%arg0: i32, %arg1: i32) -> (i32, i32, i32) {
    %c0_i32 = arith.constant 0 : i32
    %c0_i32_0 = arith.constant 0 : i32
    return %arg0, %arg1, %c0_i32 : i32, i32, i32
  }
  func.func @transform_1(%arg0: i32, %arg1: i32) -> (i32, i32) {
    %c0_i32 = arith.constant 0 : i32
    %c0_i32_0 = arith.constant 0 : i32
    return %arg1, %c0_i32 : i32, i32
  }
  func.func @transform_2(%arg0: i32, %arg1: i32) -> (i32, i32, i32) {
    %c0_i32 = arith.constant 0 : i32
    %c0_i32_0 = arith.constant 0 : i32
    return %arg0, %arg1, %c0_i32 : i32, i32, i32
  }
}

</mosaic_0001>

<bundles_post_ra>
// kernel: tpu_custom_call.1
= control target key start
LH: loop header
LB: loop body
LE: loop exit
PB: predicated region body
PF: predicated region fallthrough
CT: control target
= control target key end

     0   :  { %7 = vsyncpa [#allocation3], 0  ;;  %s715_s0 = inlined_call_operand.hbm [shape: f32[2,8,128], index: 0, kind: input, shape index: {}]   ;;  %s716_s1 = inlined_call_operand.hbm [shape: f32[8,128], index: 1, kind: input, shape index: {}]   ;;  %s717_s2 = inlined_call_operand.hbm [shape: f32[2,8,128], index: 2, kind: output, shape index: {}]  }
   0x1   :  { %9 = vsyncpa [#allocation3 + $0x1], 0 }
   0x2   :  { %10 = vsyncpa [#allocation6], 0 }
   0x3   :  { %11 = vsyncpa [#allocation4], 0 }
   0x4   :  { %13 = vsyncpa [#allocation4 + $0x1], 0  ;;  %s554_s9 = smov 0   ;;  %s556_s10 = smov 0  }
   0x5   :  { %s558_s11 = smov 0   ;;  %s560_s12 = smov 0  }
   0x6   :  { %s562_s13 = smov 0   ;;  %s564_s14 = smov 0  }
   0x7 LB: > { %s308_s15 = sadd.s32 4294967295, %s534_s14   ;;  %s309_s16 = sadd.s32 4294967294, %s534_s14   ;;  %s534_s14 = sphi %s564_s14, %s19_s14   ;;  %s530_s13 = sphi %s562_s13, %s734_s13   ;;  %s526_s12 = sphi %s560_s12, %s733_s12   ;;  %s522_s11 = sphi %s558_s11, %s732_s11   ;;  %s518_s10 = sphi %s556_s10, %s731_s10   ;;  %s514_s9 = sphi %s554_s9, %s730_s9  }
   0x8   : > { %p53_p0 = scmp.ne.s32.totalorder %s518_s10, %s514_s9  ;;  %p588_p1 = scmp.eq.s32.totalorder %s308_s15, 0 }
   0x9   : > { %p592_p2 = scmp.eq.s32.totalorder %s308_s15, 1  ;;  %p111_p3 = scmp.eq.s32.totalorder %s309_s16, 1 }
   0xa   : > { %p598_p4 = por %p588_p1, %p53_p0  ;;  %p310_p5 = scmp.ge.s32.totalorder %s534_s14, 1 }
   0xb   : > { %p603_p6 = por %p111_p3, %p53_p0  ;;  %p118_p7 = scmp.lt.s32.totalorder %s534_s14, 3 }
   0xc   : > { %s721_s19 = scalar_select %p598_p4, 1, 0 }
   0xd   : > { %s722_s20 = scalar_select %p603_p6, 1, 0 }
   0xe   : > { %p608_p8 = pnand %p310_p5, %p118_p7  ;;  %s536_s22 = smov [#allocation5]  }
   0xf   : > { %s133_s23 = sshll.u32 %s536_s22, 4  ;;  %s31_s25 = sadd.s32 1, %s530_s13  ;;  %s134_s23 = int_to_ptr.vmem [resolvable:$true] %s133_s23 }
  0x10   : > { %p331_p10 = pneg %p608_p8  ;;  %s40_s26 = sadd.s32 1, %s522_s11 }
  0x11   : > { %p33_p12 = scmp.ge.s32.totalorder %s31_s25, 2  ;;  %s407_s27 = scalar_lea.vmem %s134_s23, 128 }
  0x12   : > { %p617_p11 = pnand %p331_p10, %p588_p1  ;;  %p408_p0 = scmp.ne.s32.totalorder %s134_s23, %s407_s27 }
  0x13   : > { %p415_p7 = scmp.lt.s32.totalorder %s134_s23, %s134_s23  ;;  %p416_p6 = scmp.lt.s32.totalorder %s407_s27, %s407_s27 }
  0x14   : > { %p398_p13 = pneg %p617_p11 }
  0x15   : > { %p417_p9 = por %p416_p6, %p415_p7 }
  0x16   : > { %p410_p3 = pnand %p408_p0, %p398_p13 }
  0x18   : > { %p411_p5 = pneg %p410_p3 }
  0x1a   : > { %p418_p4 = pnand %p417_p9, %p411_p5 }
  0x1c   : > { %421 = shalt.err (!%p418_p4)
}
  0x1d   : > { %334 = dma.hbm_to_vmem [thread:$0]  (!%p617_p11), %s716_s1, 128, %s134_s23, [#allocation6]  }
  0x1e   : > { %s736_s25 = smov (%p33_p12, %s31_s25), 0  ;;  %p47_p6 = scmp.ne.s32.totalorder %s522_s11, %s518_s10 }
  0x1f   : > { %p48_p4 = scmp.eq.s32.totalorder %s534_s14, 0  ;;  %s35_s30 = ssub.s32 %s530_s13, %s736_s25 }
  0x20   : > { %p344_p9 = scmp.lt.s32.totalorder %s534_s14, 2  ;;  %p38_p10 = scmp.eq.s32.totalorder %s35_s30, 0 }
  0x21   : > { %p49_p13 = por %p48_p4, %p47_p6  ;;  %p640_p0 = por %p592_p2, %p47_p6 }
  0x22   : > { %s144_s4 = sand.u32 1, %s522_s11   ;;  %s314_s7 = sshll.u32 %s530_s13, 7 }
  0x23   : > { %s646_s5 = scalar_select %p38_p10, %s522_s11, %s40_s26  }
  0x24   : > { %s313_s6 = sshll.u32 %s144_s4, 3  ;;  %s154_s16 = scalar_lea.hbm %s715_s0, %s314_s7 }
  0x25   : > { %s148_s22 = scalar_lea.vmem [#allocation2], %s313_s6  ;;  %p652_p11 = pnand %p344_p9, %p49_p13 }
  0x26   : > { %s156_s23 = sshll.u32 %s148_s22, 4  ;;  %s145_s18 = scalar_lea.sflag [#allocation3], %s144_s4  ;;  %s157_s23 = int_to_ptr.vmem [resolvable:$true] %s156_s23 }
  0x27   : > { %p424_p2 = pneg %p652_p11  ;;  %s435_s27 = scalar_lea.vmem %s157_s23, 128 }
  0x28   : > { %p436_p12 = scmp.ne.s32.totalorder %s157_s23, %s435_s27  ;;  %s537_s26 = smov [#allocation2]  }
  0x29   : > { %s440_s28 = sshll.u32 %s537_s26, 4  ;;  %s441_s28 = int_to_ptr.vmem [resolvable:$false] %s440_s28 }
  0x2a   : > { %p438_p3 = pnand %p436_p12, %p424_p2  ;;  %s442_s29 = scalar_lea.vmem %s441_s28, 256 }
  0x2b   : > { %p443_p7 = scmp.lt.s32.totalorder %s157_s23, %s441_s28  ;;  %p444_p6 = scmp.lt.s32.totalorder %s442_s29, %s435_s27 }
  0x2c   : > { %p439_p5 = pneg %p438_p3 }
  0x2d   : > { %p445_p4 = por %p444_p6, %p443_p7 }
  0x2f   : > { %p446_p10 = pnand %p445_p4, %p439_p5 }
  0x31   : > { %449 = shalt.err (!%p446_p10)
}
  0x32   : > { %338 = dma.hbm_to_vmem [thread:$0]  (!%p652_p11), %s154_s16, 128, %s157_s23, %s145_s18  }
  0x33   : > { %165 = sbr.rel (%p608_p8) target bundleno = 83 (0x53), region = 28  ;;  %s663_s30 = sand.u32 (!%p608_p8), 1, %s518_s10  }
  0x34   : > { %s316_s4 = sshll.u32 (!%p608_p8), %s663_s30, 3  ;;  %s168_s6 = scalar_lea.sflag (!%p608_p8), [#allocation3], %s663_s30 }
  0x35   : > { %s171_s7 = scalar_lea.vmem (!%p608_p8), [#allocation2], %s316_s4  ;;  %p727_p9 = scmp.ne.s32.totalorder (!%p608_p8), %s721_s19, 0 }
  0x38   : > { %501 = dma.done.wait (%p727_p9), %s168_s6, 128  }
  0x39   : > { %503 = vsyncadd (%p727_p9), %s168_s6, 4294967168 }
  0x3a   : > { %505 = dma.done.wait (%p588_p1), [#allocation6], 128  }
  0x3b   : > { %507 = vsyncadd (%p588_p1), [#allocation6], 4294967168  ;;  %v196_v0 = vld [vmem:[%s171_s7] sm:$0xff]  ;;  %v198_v1 = vld [vmem:[#allocation5] sm:$0xff]  ;;  %s195_s21 = scalar_lea.vmem [#allocation7], %s316_s4  ;;  %s320_s15 = sshll.u32 %s526_s12, 7 }
  0x3c   : > { %s216_s8 = sshll.u32 %s195_s21, 4  ;;  %v197_v2 = vmul.f32 11.313708, %v196_v0  ;;  %s214_s22 = scalar_lea.hbm %s717_s2, %s320_s15  ;;  %s217_s8 = int_to_ptr.vmem [resolvable:$true] %s216_s8 }
  0x3d   : > { %s202_s23 = scalar_lea.sflag [#allocation4], %s663_s30  ;;  %s450_s24 = scalar_lea.vmem %s217_s8, 128 }
  0x3e   : > { %v199_v3 = vadd.f32 %v198_v1, %v197_v2  ;;  %p451_p8 = scmp.ne.s32.totalorder %s217_s8, %s450_s24  ;;  %s538_s17 = smov [#allocation7]  }
  0x3f   : > { %s454_s18 = sshll.u32 %s538_s17, 4  ;;  %s455_s18 = int_to_ptr.vmem [resolvable:$false] %s454_s18 }
  0x40   : > { %200 = vst [vmem:[%s195_s21] sm:$0xff] %v199_v3  ;;  %p452_p1 = pnand %p451_p8, %p640_p0  ;;  %s456_s27 = scalar_lea.vmem %s455_s18, 256 }
  0x41   : > { %p457_p11 = scmp.lt.s32.totalorder %s217_s8, %s455_s18  ;;  %p458_p2 = scmp.lt.s32.totalorder %s456_s27, %s450_s24 }
  0x42   : > { %p453_p13 = pneg %p452_p1 }
  0x43   : > { %p459_p12 = por %p458_p2, %p457_p11 }
  0x45   : > { %p460_p3 = pnand %p459_p12, %p453_p13 }
  0x47   : > { %463 = shalt.err (!%p460_p3)
}
  0x48   : > { %s464_s12 = scalar_lea.hbm %s214_s22, 128  ;;  %s468_s29 = scalar_lea.hbm %s717_s2, 256 }
  0x49   : > { %p465_p5 = scmp.ne.s32.totalorder %s214_s22, %s464_s12  ;;  %p469_p4 = scmp.lt.s32.totalorder %s214_s22, %s717_s2 }
  0x4a   : > { %p470_p10 = scmp.lt.s32.totalorder %s468_s29, %s464_s12 }
  0x4b   : > { %p466_p7 = pnand %p465_p5, %p640_p0 }
  0x4c   : > { %p471_p9 = por %p470_p10, %p469_p4 }
  0x4d   : > { %p467_p6 = pneg %p466_p7 }
  0x4f   : > { %p472_p8 = pnand %p471_p9, %p467_p6 }
  0x51   : > { %475 = shalt.err (!%p472_p8)
}
  0x52   : > { %329 = dma.vmem_to_hbm [thread:$0]  (%p640_p0), %s217_s8, 128, %s214_s22, %s202_s23  }
  0x53 PF: > { %s228_s6 = sand.u32 1, %s514_s9   ;;  %p728_p1 = scmp.ne.s32.totalorder %s722_s20, 0 }
  0x54   : > { %p729_p13 = scmp.ge.s32.totalorder %s534_s14, 2  ;;  %s229_s7 = scalar_lea.sflag [#allocation4], %s228_s6 }
  0x56   : > { %p340_p11 = pnand %p729_p13, %p728_p1 }
  0x58   : > { %p341_p2 = pneg %p340_p11 }
  0x5a   : > { %509 = dma.done.wait (%p341_p2), %s229_s7, 128  }
  0x5b   : > { %511 = vsyncadd (%p341_p2), %s229_s7, 4294967168  ;;  %s19_s14 = sadd.s32 1, %s534_s14   ;;  %s730_s9 = smov %s518_s10 }
  0x5c   : > { %p16_p12 = scmp.ge.s32.totalorder %s19_s14, 4   ;;  %s731_s10 = smov %s522_s11 }
  0x5d   : > { %s732_s11 = smov %s646_s5  ;;  %s733_s12 = smov %s530_s13 }
  0x5e   : > { %s734_s13 = smov %s736_s25  ;;  %18 = sbr.rel (!%p16_p12) target bundleno = 7 (0x7), region = 78 }
  0x63   :  { %234 = vsyncpa [#allocation3], 1 }
  0x64   :  { %236 = vsyncpa [#allocation3 + $0x1], 1 }
  0x65   :  { %237 = vsyncpa [#allocation6], 1 }
  0x66   :  { %238 = vsyncpa [#allocation4], 1 }
  0x67   :  { %240 = vsyncpa [#allocation4 + $0x1], 1 }

</bundles_post_ra>
